<compile_context>
chip_gen: v7x
topology: tpu7x:2x2x1
jax: 0.10.0
libtpu: 0.0.40
codegen_flags: <defaults>
</compile_context>

<pallas_src>
import jax
import jax.numpy as jnp
from jax import lax
from jax.experimental import pallas as pl
from jax.experimental.pallas import tpu as pltpu

FEAT_DIM = 256          # per-frame feature size F (stat pooling -> 2F = 512)
CLASS_PAD = 128         # classifier head padded to a full lane width
NEG_INF = -1e30         # bias for padded class columns -> padded logits never win max / lse


def _round_up(x, m):
    return -(-x // m) * m


def _accent_kernel_factory(T, TT, TB, nt, rem, sub):
    """Builds the kernel with the *true* time length T and static tiling baked in."""
    inv_T = 1.0 / float(T)
    # torch.std is unbiased (divides by T-1); T == 1 would be NaN in torch - we guard instead.
    inv_Tm1 = 1.0 / float(max(T - 1, 1))

    def kernel(feat_ref, labels_ref,
               w1m_ref, w1s_ref, b1_ref, w2_ref, b2_ref, w3_ref, b3_ref,
               preds_ref, ce_ref,
               sum_acc, sq_acc):
        t = pl.program_id(1)

        @pl.when(t == 0)
        def _init():
            sum_acc[...] = jnp.zeros_like(sum_acc)
            sq_acc[...] = jnp.zeros_like(sq_acc)

        # feat is streamed in its native dtype (f32 or bf16) and upcast here; accumulators are f32.
        x = feat_ref[...].astype(jnp.float32)            # (TB, TT, F)

        def _accumulate(xv):
            # Deferred sublane collapse: keep (TB, sub, F) partial sums.  The per-slab adds are
            # vreg-aligned VALU ops (no cross-sublane XLU reduce, no single-row scatter per step);
            # the sub -> 1 collapse happens once at finalize.
            if sub == 8 and TT > 8:
                ps = xv[:, 0:8, :]
                pq = ps * ps
                for i in range(1, TT // 8):
                    xi = xv[:, 8 * i:8 * (i + 1), :]
                    ps = ps + xi
                    pq = pq + xi * xi
                sum_acc[...] += ps
                sq_acc[...] += pq
            elif sub == 8:                               # TT == 8: block is exactly one slab
                sum_acc[...] += xv
                sq_acc[...] += xv * xv
            else:                                        # small / sublane-unaligned T: single tile
                sum_acc[...] += jnp.sum(xv, axis=1, keepdims=True)
                sq_acc[...] += jnp.sum(xv * xv, axis=1, keepdims=True)

        if rem == 0:
            _accumulate(x)
        else:
            # feat is NOT zero-padded in HBM, so the out-of-range rows of the ragged last time
            # tile hold unspecified data and must be zeroed before accumulation.
            @pl.when(t < nt - 1)
            def _body():
                _accumulate(x)

            @pl.when(t == nt - 1)
            def _tail():
                valid = lax.broadcasted_iota(jnp.int32, (1, TT, FEAT_DIM), 1) < rem
                _accumulate(jnp.where(valid, x, 0.0))

        @pl.when(t == nt - 1)
        def _finalize():
            s = jnp.sum(sum_acc[...], axis=1)            # one-time sublane collapse -> (TB, F)
            q = jnp.sum(sq_acc[...], axis=1)
            mean = s * inv_T
            var = (q - float(T) * mean * mean) * inv_Tm1                  # unbiased, single-pass
            std = jnp.sqrt(jnp.maximum(var, 0.0))

            # ---- MLP 512 -> 256 -> 128 -> 128(padded classes); concat avoided via split W1
            h1 = jnp.maximum(
                jnp.dot(mean, w1m_ref[...], preferred_element_type=jnp.float32)
                + jnp.dot(std, w1s_ref[...], preferred_element_type=jnp.float32)
                + b1_ref[...], 0.0)
            h2 = jnp.maximum(
                jnp.dot(h1, w2_ref[...], preferred_element_type=jnp.float32)
                + b2_ref[...], 0.0)
            logits = (jnp.dot(h2, w3_ref[...], preferred_element_type=jnp.float32)
                      + b3_ref[...])                                      # (TB, 128) lane-dense
            preds_ref[...] = logits.astype(preds_ref.dtype)

            # ---- per-sample cross-entropy (padded cols sit at -1e30 -> exp underflows to 0)
            m = jnp.max(logits, axis=-1, keepdims=True)
            lse = m + jnp.log(jnp.sum(jnp.exp(logits - m), axis=-1, keepdims=True))
            labels = labels_ref[...]                                      # (TB, 1) int32
            onehot = (lax.broadcasted_iota(jnp.int32, logits.shape, 1)
                      == labels).astype(jnp.float32)
            label_logit = jnp.sum(logits * onehot, axis=-1, keepdims=True)
            ce = lse - label_logit                                        # (TB, 1)
            # lane-dense store of per-sample CE; wrapper reads column 0 and takes the batch mean
            ce_ref[...] = jnp.broadcast_to(ce, ce_ref.shape).astype(ce_ref.dtype)

    return kernel


def _pick_tiles(B, T):
    """Per-generation tile sizing. v5e/v6e: 1 TensorCore, 128 MiB VMEM; v7x/unknown: 2 TCs, 64 MiB/TC."""
    kind = ""
    try:
        kind = jax.devices()[0].device_kind.lower()
    except Exception:
        pass
    if ("v5" in kind) or ("v6" in kind):
        n_cores, vmem_limit = 1, 48 * 1024 * 1024    # right-sized: ~36 MiB footprint at 128x128 tiles
    else:                                            # v7x / unknown: conservative but 2 cores
        n_cores, vmem_limit = 2, 52 * 1024 * 1024
    tt_pref = 128                                    # (128,128,256) f32 tile = 16 MiB per buffer

    # time tile: whole T if it fits in a single tile (always layout-legal), otherwise a
    # multiple-of-8 tile whose ragged tail is masked inside the kernel (no HBM padding).
    TT = T if T <= tt_pref else tt_pref

    # batch tile: multiple of 8, <= 128, <= B; ragged last tile handled by clipped output writes.
    if B < 8:
        TB = B
    else:
        TB = min(128, (B // 8) * 8)
        if n_cores > 1 and B > 8 and -(-B // TB) < n_cores:
            # guarantee >= 2 batch tiles so the "parallel" axis can shard across TensorCores
            # TODO(synk): if a trace shows plain "parallel" not sharding on 2-TC parts, switch
            # the batch axis to core-parallel semantics.
            TB = min(TB, _round_up(-(-B // n_cores), 8))
        # balance tile sizes so a nearly-empty ragged tail tile doesn't waste a full pass
        nb = -(-B // TB)
        TB = min(TB, _round_up(-(-B // nb), 8))
    return TB, TT, vmem_limit


def accent_classifier_forward(feat, labels, params):
    """feat: (B, T, 256) float32 or bfloat16, labels: (B,) int.
    Returns (predictions (B, C), loss scalar) matching AccentClassifier.forward."""
    B, T, F = feat.shape
    assert F == FEAT_DIM
    w1, b1 = params["w1"], params["b1"]   # (512, 256), (1, 256)   -- (in, out) layout
    w2, b2 = params["w2"], params["b2"]   # (256, 128), (1, 128)
    w3, b3 = params["w3"], params["b3"]   # (128, C),   (1, C)
    C = w3.shape[1]
    assert C <= CLASS_PAD

    TB, TT, vmem_limit = _pick_tiles(B, T)
    nb = -(-B // TB)
    nt = -(-T // TT)
    rem = T % TT                          # ragged last time tile (masked in-kernel) if nonzero
    sub = 8 if TT % 8 == 0 else 1         # partial-accumulator sublane depth

    # feat goes to the kernel untouched: no astype / jnp.pad pass over HBM.
    labels2 = labels.astype(jnp.int32).reshape(B, 1)

    # split W1 (avoids concat(mean, std)); pad classifier head to a full 128-lane slab
    w1m, w1s = w1[:FEAT_DIM, :], w1[FEAT_DIM:, :]
    w3_p = jnp.pad(w3.astype(jnp.float32), ((0, 0), (0, CLASS_PAD - C)))
    b3_p = jnp.pad(b3.astype(jnp.float32), ((0, 0), (0, CLASS_PAD - C)),
                   constant_values=NEG_INF)

    kernel = _accent_kernel_factory(T, TT, TB, nt, rem, sub)

    def full(shape):  # resident array: constant index map -> DMA'd once, stays in VMEM
        return pl.BlockSpec(shape, lambda b, t: (0,) * len(shape))

    grid_spec = pltpu.PrefetchScalarGridSpec(
        num_scalar_prefetch=0,
        grid=(nb, nt),
        in_specs=[
            pl.BlockSpec((TB, TT, FEAT_DIM), lambda b, t: (b, t, 0)),   # feat (streamed)
            pl.BlockSpec((TB, 1), lambda b, t: (b, 0)),                 # labels per batch tile
            full((FEAT_DIM, 256)),       # W1 mean half
            full((FEAT_DIM, 256)),       # W1 std half
            full((1, 256)),              # b1
            full((256, 128)),            # W2
            full((1, 128)),              # b2
            full((128, CLASS_PAD)),      # W3 (zero-padded cols)
            full((1, CLASS_PAD)),        # b3 (-inf padded cols)
        ],
        out_specs=[
            pl.BlockSpec((TB, CLASS_PAD), lambda b, t: (b, 0)),         # padded logits
            pl.BlockSpec((TB, CLASS_PAD), lambda b, t: (b, 0)),         # per-sample CE (lane-dense)
        ],
        scratch_shapes=[
            pltpu.VMEM((TB, sub, FEAT_DIM), jnp.float32),   # running partial sums
            pltpu.VMEM((TB, sub, FEAT_DIM), jnp.float32),   # running partial sums of squares
        ],
    )

    preds_p, ce_p = pl.pallas_call(
        kernel,
        out_shape=(jax.ShapeDtypeStruct((B, CLASS_PAD), jnp.float32),
                   jax.ShapeDtypeStruct((B, CLASS_PAD), jnp.float32)),
        grid_spec=grid_spec,
        compiler_params=pltpu.CompilerParams(
            dimension_semantics=("parallel", "arbitrary"),
            vmem_limit_bytes=vmem_limit),
    )(feat, labels2, w1m, w1s, b1, w2, b2, w3_p, b3_p)

    preds = preds_p[:, :C]
    loss = jnp.mean(ce_p[:, 0])
    return preds, loss


def init_params(key, num_classes=10):
    k1, k2, k3, k4, k5, k6 = jax.random.split(key, 6)
    # deterministic synthetic init (PyTorch layout is (out,in); stored here as (in,out))
    return {
        "w1": jax.random.normal(k1, (512, 256), jnp.float32) * 0.04,
        "b1": jax.random.normal(k2, (1, 256), jnp.float32) * 0.01,
        "w2": jax.random.normal(k3, (256, 128), jnp.float32) * 0.06,
        "b2": jax.random.normal(k4, (1, 128), jnp.float32) * 0.01,
        "w3": jax.random.normal(k5, (128, num_classes), jnp.float32) * 0.08,
        "b3": jax.random.normal(k6, (1, num_classes), jnp.float32) * 0.01,
    }


def reference_forward(feat, labels, params):
    mean = jnp.mean(feat, axis=1)
    std = jnp.std(feat, axis=1, ddof=1)
    stat = jnp.concatenate([mean, std], axis=-1)
    h1 = jnp.maximum(stat @ params["w1"] + params["b1"], 0.0)
    h2 = jnp.maximum(h1 @ params["w2"] + params["b2"], 0.0)
    logits = h2 @ params["w3"] + params["b3"]
    logp = logits - jax.scipy.special.logsumexp(logits, axis=-1, keepdims=True)
    loss = -jnp.mean(jnp.take_along_axis(logp, labels[:, None], axis=-1))
    return logits, loss


if __name__ == "__main__":
    key = jax.random.PRNGKey(0)
    kf, kl, kp, kf2, kl2 = jax.random.split(key, 5)

    C = 10
    params = init_params(kp, num_classes=C)

    # small shape consistent with the module: batch=2, seq=8, feature=256
    B, T = 2, 8
    feat = jax.random.normal(kf, (B, T, FEAT_DIM), jnp.float32)
    labels = jax.random.randint(kl, (B,), 0, C, jnp.int32)

    preds, loss = accent_classifier_forward(feat, labels, params)
    jax.block_until_ready((preds, loss))
    ref_preds, ref_loss = reference_forward(feat, labels, params)
    assert preds.shape == (B, C) and loss.shape == ()
    assert jnp.allclose(preds, ref_preds, atol=1e-4, rtol=1e-4)
    assert jnp.allclose(loss, ref_loss, atol=1e-4, rtol=1e-4)

    # second check: exercises multi-tile streaming, the in-kernel ragged time-tile mask,
    # ragged batch tiles and the deferred-sublane partial accumulators (still small: ~2 MiB).
    B2, T2 = 10, 200
    feat2 = jax.random.normal(kf2, (B2, T2, FEAT_DIM), jnp.float32)
    labels2 = jax.random.randint(kl2, (B2,), 0, C, jnp.int32)

    preds2, loss2 = accent_classifier_forward(feat2, labels2, params)
    jax.block_until_ready((preds2, loss2))
    ref_preds2, ref_loss2 = reference_forward(feat2, labels2, params)
    assert preds2.shape == (B2, C) and loss2.shape == ()
    assert jnp.allclose(preds2, ref_preds2, atol=1e-4, rtol=1e-4)
    assert jnp.allclose(loss2, ref_loss2, atol=1e-4, rtol=1e-4)

    print("KERNEL_OK")
</pallas_src>

<mosaic_0001>
module attributes {stable_mosaic.version = 11 : i64} {
  func.func @kernel(%arg0: i32, %arg1: i32, %arg2: memref<2x8x256xf32, #tpu.memory_space<vmem>>, %arg3: memref<2x1xi32, #tpu.memory_space<vmem>>, %arg4: memref<256x256xf32, #tpu.memory_space<vmem>>, %arg5: memref<256x256xf32, #tpu.memory_space<vmem>>, %arg6: memref<1x256xf32, #tpu.memory_space<vmem>>, %arg7: memref<256x128xf32, #tpu.memory_space<vmem>>, %arg8: memref<1x128xf32, #tpu.memory_space<vmem>>, %arg9: memref<128x128xf32, #tpu.memory_space<vmem>>, %arg10: memref<1x128xf32, #tpu.memory_space<vmem>>, %arg11: memref<2x128xf32, #tpu.memory_space<vmem>>, %arg12: memref<2x128xf32, #tpu.memory_space<vmem>>, %arg13: memref<2x8x256xf32, #tpu.memory_space<vmem>>, %arg14: memref<2x8x256xf32, #tpu.memory_space<vmem>>) attributes {dimension_semantics = [#tpu.dimension_semantics<parallel>, #tpu.dimension_semantics<arbitrary>], iteration_bounds = array<i64: 1, 1>, scalar_prefetch = 0 : i64, scratch_operands = 2 : i64, tpu.core_type = #tpu.core_type<tc>, window_params = [{transform_indices = @transform_0, window_bounds = array<i64: 2, 8, 256>}, {transform_indices = @transform_1, window_bounds = array<i64: 2, 1>}, {pipeline_mode = #tpu.pipeline_mode<synchronous>, transform_indices = @transform_2, window_bounds = array<i64: 256, 256>}, {pipeline_mode = #tpu.pipeline_mode<synchronous>, transform_indices = @transform_3, window_bounds = array<i64: 256, 256>}, {pipeline_mode = #tpu.pipeline_mode<synchronous>, transform_indices = @transform_4, window_bounds = array<i64: 1, 256>}, {pipeline_mode = #tpu.pipeline_mode<synchronous>, transform_indices = @transform_5, window_bounds = array<i64: 256, 128>}, {pipeline_mode = #tpu.pipeline_mode<synchronous>, transform_indices = @transform_6, window_bounds = array<i64: 1, 128>}, {pipeline_mode = #tpu.pipeline_mode<synchronous>, transform_indices = @transform_7, window_bounds = array<i64: 128, 128>}, {pipeline_mode = #tpu.pipeline_mode<synchronous>, transform_indices = @transform_8, window_bounds = array<i64: 1, 128>}, {transform_indices = @transform_9, window_bounds = array<i64: 2, 128>}, {transform_indices = @transform_10, window_bounds = array<i64: 2, 128>}]} {
    %c0_i32 = arith.constant 0 : i32
    %0 = arith.cmpi eq, %arg1, %c0_i32 : i32
    %1 = arith.extui %0 : i1 to i32
    %c0_i32_0 = arith.constant 0 : i32
    %2 = arith.cmpi ne, %1, %c0_i32_0 : i32
    scf.if %2 {
      %cst = arith.constant 0.000000e+00 : f32
      %14 = vector.broadcast %cst : f32 to vector<2x8x256xf32>
      %c0_17 = arith.constant 0 : index
      %c0_18 = arith.constant 0 : index
      %c0_19 = arith.constant 0 : index
      %15 = vector.load %arg13[%c0_17, %c0_18, %c0_19] : memref<2x8x256xf32, #tpu.memory_space<vmem>>, vector<2x8x256xf32>
      tpu.vector_store %arg13[%c0_17, %c0_18, %c0_19], %14 {strides = array<i32>} : memref<2x8x256xf32, #tpu.memory_space<vmem>>, vector<2x8x256xf32>,
      %cst_20 = arith.constant 0.000000e+00 : f32
      %16 = vector.broadcast %cst_20 : f32 to vector<2x8x256xf32>
      %c0_21 = arith.constant 0 : index
      %c0_22 = arith.constant 0 : index
      %c0_23 = arith.constant 0 : index
      %17 = vector.load %arg14[%c0_21, %c0_22, %c0_23] : memref<2x8x256xf32, #tpu.memory_space<vmem>>, vector<2x8x256xf32>
      tpu.vector_store %arg14[%c0_21, %c0_22, %c0_23], %16 {strides = array<i32>} : memref<2x8x256xf32, #tpu.memory_space<vmem>>, vector<2x8x256xf32>,
    } else {
    }
    %c0 = arith.constant 0 : index
    %c0_1 = arith.constant 0 : index
    %c0_2 = arith.constant 0 : index
    %3 = vector.load %arg2[%c0, %c0_1, %c0_2] : memref<2x8x256xf32, #tpu.memory_space<vmem>>, vector<2x8x256xf32>
    %c0_3 = arith.constant 0 : index
    %c0_4 = arith.constant 0 : index
    %c0_5 = arith.constant 0 : index
    %4 = vector.load %arg13[%c0_3, %c0_4, %c0_5] : memref<2x8x256xf32, #tpu.memory_space<vmem>>, vector<2x8x256xf32>
    %5 = arith.addf %4, %3 : vector<2x8x256xf32>
    %c0_6 = arith.constant 0 : index
    %c0_7 = arith.constant 0 : index
    %c0_8 = arith.constant 0 : index
    %6 = vector.load %arg13[%c0_6, %c0_7, %c0_8] : memref<2x8x256xf32, #tpu.memory_space<vmem>>, vector<2x8x256xf32>
    tpu.vector_store %arg13[%c0_6, %c0_7, %c0_8], %5 {strides = array<i32>} : memref<2x8x256xf32, #tpu.memory_space<vmem>>, vector<2x8x256xf32>,
    %c0_9 = arith.constant 0 : index
    %c0_10 = arith.constant 0 : index
    %c0_11 = arith.constant 0 : index
    %7 = vector.load %arg14[%c0_9, %c0_10, %c0_11] : memref<2x8x256xf32, #tpu.memory_space<vmem>>, vector<2x8x256xf32>
    %8 = arith.mulf %3, %3 : vector<2x8x256xf32>
    %9 = arith.addf %7, %8 : vector<2x8x256xf32>
    %c0_12 = arith.constant 0 : index
    %c0_13 = arith.constant 0 : index
    %c0_14 = arith.constant 0 : index
    %10 = vector.load %arg14[%c0_12, %c0_13, %c0_14] : memref<2x8x256xf32, #tpu.memory_space<vmem>>, vector<2x8x256xf32>
    tpu.vector_store %arg14[%c0_12, %c0_13, %c0_14], %9 {strides = array<i32>} : memref<2x8x256xf32, #tpu.memory_space<vmem>>, vector<2x8x256xf32>,
    %c0_i32_15 = arith.constant 0 : i32
    %11 = arith.cmpi eq, %arg1, %c0_i32_15 : i32
    %12 = arith.extui %11 : i1 to i32
    %c0_i32_16 = arith.constant 0 : i32
    %13 = arith.cmpi ne, %12, %c0_i32_16 : i32
    scf.if %13 {
      %c0_17 = arith.constant 0 : index
      %c0_18 = arith.constant 0 : index
      %c0_19 = arith.constant 0 : index
      %14 = vector.load %arg13[%c0_17, %c0_18, %c0_19] : memref<2x8x256xf32, #tpu.memory_space<vmem>>, vector<2x8x256xf32>
      %cst = arith.constant dense<0.000000e+00> : vector<2x256xf32>
      %15 = vector.multi_reduction <add>, %14, %cst [1] : vector<2x8x256xf32> to vector<2x256xf32>
      %c0_20 = arith.constant 0 : index
      %c0_21 = arith.constant 0 : index
      %c0_22 = arith.constant 0 : index
      %16 = vector.load %arg14[%c0_20, %c0_21, %c0_22] : memref<2x8x256xf32, #tpu.memory_space<vmem>>, vector<2x8x256xf32>
      %cst_23 = arith.constant dense<0.000000e+00> : vector<2x256xf32>
      %17 = vector.multi_reduction <add>, %16, %cst_23 [1] : vector<2x8x256xf32> to vector<2x256xf32>
      %cst_24 = arith.constant 1.250000e-01 : f32
      %18 = vector.broadcast %cst_24 : f32 to vector<2x256xf32>
      %19 = arith.mulf %15, %18 : vector<2x256xf32>
      %cst_25 = arith.constant 8.000000e+00 : f32
      %20 = vector.broadcast %cst_25 : f32 to vector<2x256xf32>
      %21 = arith.mulf %20, %19 : vector<2x256xf32>
      %22 = arith.mulf %21, %19 : vector<2x256xf32>
      %23 = arith.subf %17, %22 : vector<2x256xf32>
      %cst_26 = arith.constant 0.142857149 : f32
      %24 = vector.broadcast %cst_26 : f32 to vector<2x256xf32>
      %25 = arith.mulf %23, %24 : vector<2x256xf32>
      %cst_27 = arith.constant 0.000000e+00 : f32
      %26 = vector.broadcast %cst_27 : f32 to vector<2x256xf32>
      %27 = arith.maximumf %25, %26 : vector<2x256xf32>
      %28 = math.sqrt %27 : vector<2x256xf32>
      %c0_28 = arith.constant 0 : index
      %c0_29 = arith.constant 0 : index
      %29 = vector.load %arg4[%c0_28, %c0_29] : memref<256x256xf32, #tpu.memory_space<vmem>>, vector<256x256xf32>
      %cst_30 = arith.constant dense<0.000000e+00> : vector<2x256xf32>
      %30 = tpu.matmul %19, %29, %cst_30 {dimension_numbers = #tpu.dot_dimension_numbers<[1], [0], [0], [1], [0, 0, 1, 1], [], []>} : vector<2x256xf32>, vector<256x256xf32>, vector<2x256xf32> -> vector<2x256xf32>
      %c0_31 = arith.constant 0 : index
      %c0_32 = arith.constant 0 : index
      %31 = vector.load %arg5[%c0_31, %c0_32] : memref<256x256xf32, #tpu.memory_space<vmem>>, vector<256x256xf32>
      %cst_33 = arith.constant dense<0.000000e+00> : vector<2x256xf32>
      %32 = tpu.matmul %28, %31, %cst_33 {dimension_numbers = #tpu.dot_dimension_numbers<[1], [0], [0], [1], [0, 0, 1, 1], [], []>} : vector<2x256xf32>, vector<256x256xf32>, vector<2x256xf32> -> vector<2x256xf32>
      %33 = arith.addf %30, %32 : vector<2x256xf32>
      %c0_34 = arith.constant 0 : index
      %c0_35 = arith.constant 0 : index
      %34 = vector.load %arg6[%c0_34, %c0_35] : memref<1x256xf32, #tpu.memory_space<vmem>>, vector<1x256xf32>
      %35 = vector.broadcast %34 : vector<1x256xf32> to vector<2x256xf32>
      %36 = arith.addf %33, %35 : vector<2x256xf32>
      %cst_36 = arith.constant 0.000000e+00 : f32
      %37 = vector.broadcast %cst_36 : f32 to vector<2x256xf32>
      %38 = arith.maximumf %36, %37 : vector<2x256xf32>
      %c0_37 = arith.constant 0 : index
      %c0_38 = arith.constant 0 : index
      %39 = vector.load %arg7[%c0_37, %c0_38] : memref<256x128xf32, #tpu.memory_space<vmem>>, vector<256x128xf32>
      %cst_39 = arith.constant dense<0.000000e+00> : vector<2x128xf32>
      %40 = tpu.matmul %38, %39, %cst_39 {dimension_numbers = #tpu.dot_dimension_numbers<[1], [0], [0], [1], [0, 0, 1, 1], [], []>} : vector<2x256xf32>, vector<256x128xf32>, vector<2x128xf32> -> vector<2x128xf32>
      %c0_40 = arith.constant 0 : index
      %c0_41 = arith.constant 0 : index
      %41 = vector.load %arg8[%c0_40, %c0_41] : memref<1x128xf32, #tpu.memory_space<vmem>>, vector<1x128xf32>
      %42 = vector.broadcast %41 : vector<1x128xf32> to vector<2x128xf32>
      %43 = arith.addf %40, %42 : vector<2x128xf32>
      %cst_42 = arith.constant 0.000000e+00 : f32
      %44 = vector.broadcast %cst_42 : f32 to vector<2x128xf32>
      %45 = arith.maximumf %43, %44 : vector<2x128xf32>
      %c0_43 = arith.constant 0 : index
      %c0_44 = arith.constant 0 : index
      %46 = vector.load %arg9[%c0_43, %c0_44] : memref<128x128xf32, #tpu.memory_space<vmem>>, vector<128x128xf32>
      %cst_45 = arith.constant dense<0.000000e+00> : vector<2x128xf32>
      %47 = tpu.matmul %45, %46, %cst_45 {dimension_numbers = #tpu.dot_dimension_numbers<[1], [0], [0], [1], [0, 0, 1, 1], [], []>} : vector<2x128xf32>, vector<128x128xf32>, vector<2x128xf32> -> vector<2x128xf32>
      %c0_46 = arith.constant 0 : index
      %c0_47 = arith.constant 0 : index
      %48 = vector.load %arg10[%c0_46, %c0_47] : memref<1x128xf32, #tpu.memory_space<vmem>>, vector<1x128xf32>
      %49 = vector.broadcast %48 : vector<1x128xf32> to vector<2x128xf32>
      %50 = arith.addf %47, %49 : vector<2x128xf32>
      %c0_48 = arith.constant 0 : index
      %c0_49 = arith.constant 0 : index
      %51 = vector.load %arg11[%c0_48, %c0_49] : memref<2x128xf32, #tpu.memory_space<vmem>>, vector<2x128xf32>
      tpu.vector_store %arg11[%c0_48, %c0_49], %50 {strides = array<i32>} : memref<2x128xf32, #tpu.memory_space<vmem>>, vector<2x128xf32>,
      %cst_50 = arith.constant dense<0xFF800000> : vector<2xf32>
      %52 = vector.multi_reduction <maximumf>, %50, %cst_50 [1] : vector<2x128xf32> to vector<2xf32>
      %53 = vector.shape_cast %52 : vector<2xf32> to vector<2x1xf32>
      %54 = vector.broadcast %53 : vector<2x1xf32> to vector<2x128xf32>
      %55 = arith.subf %50, %54 : vector<2x128xf32>
      %56 = math.exp %55 : vector<2x128xf32>
      %cst_51 = arith.constant dense<0.000000e+00> : vector<2xf32>
      %57 = vector.multi_reduction <add>, %56, %cst_51 [1] : vector<2x128xf32> to vector<2xf32>
      %58 = vector.shape_cast %57 : vector<2xf32> to vector<2x1xf32>
      %59 = math.log %58 : vector<2x1xf32>
      %60 = arith.addf %53, %59 : vector<2x1xf32>
      %c0_52 = arith.constant 0 : index
      %c0_53 = arith.constant 0 : index
      %61 = vector.load %arg3[%c0_52, %c0_53] : memref<2x1xi32, #tpu.memory_space<vmem>>, vector<2x1xi32>
      %62 = tpu.iota {dimensions = array<i32: 1>} : vector<2x128xi32>
      %63 = vector.broadcast %61 : vector<2x1xi32> to vector<2x128xi32>
      %64 = arith.cmpi eq, %62, %63 : vector<2x128xi32>
      %65 = arith.extui %64 : vector<2x128xi1> to vector<2x128xi32>
      %66 = arith.sitofp %65 : vector<2x128xi32> to vector<2x128xf32>
      %67 = arith.mulf %50, %66 : vector<2x128xf32>
      %cst_54 = arith.constant dense<0.000000e+00> : vector<2xf32>
      %68 = vector.multi_reduction <add>, %67, %cst_54 [1] : vector<2x128xf32> to vector<2xf32>
      %69 = vector.shape_cast %68 : vector<2xf32> to vector<2x1xf32>
      %70 = arith.subf %60, %69 : vector<2x1xf32>
      %71 = vector.shape_cast %70 : vector<2x1xf32> to vector<2x1xf32>
      %72 = vector.broadcast %71 : vector<2x1xf32> to vector<2x128xf32>
      %c0_55 = arith.constant 0 : index
      %c0_56 = arith.constant 0 : index
      %73 = vector.load %arg12[%c0_55, %c0_56] : memref<2x128xf32, #tpu.memory_space<vmem>>, vector<2x128xf32>
      tpu.vector_store %arg12[%c0_55, %c0_56], %72 {strides = array<i32>} : memref<2x128xf32, #tpu.memory_space<vmem>>, vector<2x128xf32>,
    } else {
    }
    return
  }
  func.func @transform_0(%arg0: i32, %arg1: i32) -> (i32, i32, i32) {
    %c0_i32 = arith.constant 0 : i32
    %c0_i32_0 = arith.constant 0 : i32
    return %arg0, %arg1, %c0_i32 : i32, i32, i32
  }
  func.func @transform_1(%arg0: i32, %arg1: i32) -> (i32, i32) {
    %c0_i32 = arith.constant 0 : i32
    %c0_i32_0 = arith.constant 0 : i32
    return %arg0, %c0_i32 : i32, i32
  }
  func.func @transform_2(%arg0: i32, %arg1: i32) -> (i32, i32) {
    %c0_i32 = arith.constant 0 : i32
    %c0_i32_0 = arith.constant 0 : i32
    %c0_i32_1 = arith.constant 0 : i32
    return %c0_i32, %c0_i32_0 : i32, i32
  }
  func.func @transform_3(%arg0: i32, %arg1: i32) -> (i32, i32) {
    %c0_i32 = arith.constant 0 : i32
    %c0_i32_0 = arith.constant 0 : i32
    %c0_i32_1 = arith.constant 0 : i32
    return %c0_i32, %c0_i32_0 : i32, i32
  }
  func.func @transform_4(%arg0: i32, %arg1: i32) -> (i32, i32) {
    %c0_i32 = arith.constant 0 : i32
    %c0_i32_0 = arith.constant 0 : i32
    %c0_i32_1 = arith.constant 0 : i32
    return %c0_i32, %c0_i32_0 : i32, i32
  }
  func.func @transform_5(%arg0: i32, %arg1: i32) -> (i32, i32) {
    %c0_i32 = arith.constant 0 : i32
    %c0_i32_0 = arith.constant 0 : i32
    %c0_i32_1 = arith.constant 0 : i32
    return %c0_i32, %c0_i32_0 : i32, i32
  }
  func.func @transform_6(%arg0: i32, %arg1: i32) -> (i32, i32) {
    %c0_i32 = arith.constant 0 : i32
    %c0_i32_0 = arith.constant 0 : i32
    %c0_i32_1 = arith.constant 0 : i32
    return %c0_i32, %c0_i32_0 : i32, i32
  }
  func.func @transform_7(%arg0: i32, %arg1: i32) -> (i32, i32) {
    %c0_i32 = arith.constant 0 : i32
    %c0_i32_0 = arith.constant 0 : i32
    %c0_i32_1 = arith.constant 0 : i32
    return %c0_i32, %c0_i32_0 : i32, i32
  }
  func.func @transform_8(%arg0: i32, %arg1: i32) -> (i32, i32) {
    %c0_i32 = arith.constant 0 : i32
    %c0_i32_0 = arith.constant 0 : i32
    %c0_i32_1 = arith.constant 0 : i32
    return %c0_i32, %c0_i32_0 : i32, i32
  }
  func.func @transform_9(%arg0: i32, %arg1: i32) -> (i32, i32) {
    %c0_i32 = arith.constant 0 : i32
    %c0_i32_0 = arith.constant 0 : i32
    return %arg0, %c0_i32 : i32, i32
  }
  func.func @transform_10(%arg0: i32, %arg1: i32) -> (i32, i32) {
    %c0_i32 = arith.constant 0 : i32
    %c0_i32_0 = arith.constant 0 : i32
    return %arg0, %c0_i32 : i32, i32
  }
}

</mosaic_0001>

<bundles_post_ra>
// kernel: tpu_custom_call.1
= control target key start
LH: loop header
LB: loop body
LE: loop exit
PB: predicated region body
PF: predicated region fallthrough
CT: control target
= control target key end

     0   :  { %16 = vsyncpa [#allocation5], 0  ;;  %s1614_s0 = inlined_call_operand.hbm [shape: f32[2,8,256], index: 0, kind: input, shape index: {}]   ;;  %s1615_s1 = inlined_call_operand.vmem [shape: s32[2,1], index: 1, kind: input, shape index: {}]   ;;  %s1616_s2 = inlined_call_operand.hbm [shape: f32[256,256], index: 2, kind: input, shape index: {}]   ;;  %s1617_s3 = inlined_call_operand.hbm [shape: f32[256,256], index: 3, kind: input, shape index: {}]   ;;  %s1618_s4 = inlined_call_operand.vmem [shape: f32[1,256], index: 4, kind: input, shape index: {}]   ;;  %s1619_s5 = inlined_call_operand.hbm [shape: f32[256,128], index: 5, kind: input, shape index: {}]   ;;  %s1620_s6 = inlined_call_operand.vmem [shape: f32[1,128], index: 6, kind: input, shape index: {}]   ;;  %s1621_s7 = inlined_call_operand.hbm [shape: f32[128,128], index: 7, kind: input, shape index: {}]   ;;  %s1622_s8 = inlined_call_operand.vmem [shape: f32[1,128], index: 8, kind: input, shape index: {}]   ;;  %s1623_s9 = inlined_call_operand.hbm [shape: f32[2,128], index: 9, kind: output, shape index: {0}]   ;;  %s1624_s10 = inlined_call_operand.hbm [shape: f32[2,128], index: 10, kind: output, shape index: {1}]  }
   0x1   :  { %17 = vsyncpa [#allocation8], 0 }
   0x2   :  { %18 = vsyncpa [#allocation11], 0 }
   0x3   :  { %19 = vsyncpa [#allocation6], 0 }
   0x4   :  { %20 = vsyncpa [#allocation15], 0  ;;  %s1293_s13 = smov [#allocation7]   ;;  %s1294_s15 = smov [#allocation10]  }
   0x5   :  { %s40_s14 = sshll.u32 %s1293_s13, 4  ;;  %s66_s16 = sshll.u32 %s1294_s15, 4  ;;  %s41_s14 = int_to_ptr.vmem [resolvable:$true] %s40_s14  ;;  %s1363_s16 = int_to_ptr.vmem [resolvable:$true] %s66_s16 }
   0x6   :  { %s1129_s19 = scalar_lea.hbm %s1616_s2, 8192 }
   0x7   :  { %p1130_p0 = scmp.ne.s32.totalorder %s1616_s2, %s1129_s19  ;;  %p1133_p1 = scmp.lt.u32.totalorder %s1129_s19, %s1616_s2 }
   0x9   :  { %p1135_p2 = pnand %p1133_p1, %p1130_p0 }
   0xb   :  { %1138 = shalt.err (!%p1135_p2)
}
   0xc   :  { %s1139_s24 = scalar_lea.vmem %s41_s14, 8192  ;;  %p1144_p4 = scmp.lt.s32.totalorder %s41_s14, %s41_s14 }
   0xd   :  { %p1140_p3 = scmp.ne.s32.totalorder %s41_s14, %s1139_s24  ;;  %p1145_p5 = scmp.lt.s32.totalorder %s1139_s24, %s1139_s24 }
   0xf   :  { %p1146_p6 = por %p1145_p5, %p1144_p4 }
  0x11   :  { %p1147_p7 = pnand %p1146_p6, %p1140_p3 }
  0x13   :  { %1150 = shalt.err (!%p1147_p7)
}
  0x14   :  { %s1295_s25 = smov 256   ;;  %s1296_s26 = smov 16  }
  0x15   :  { %46 = dma.hbm_to_vmem [thread:$0]  %s1616_s2, 8192, %s41_s14, [#allocation8], %s1295_s25, %s1295_s25, %s1296_s26  }
  0x16   :  { %s1151_s11 = scalar_lea.hbm %s1619_s5, 4096 }
  0x17   :  { %p1152_p8 = scmp.ne.s32.totalorder %s1619_s5, %s1151_s11  ;;  %p1155_p9 = scmp.lt.u32.totalorder %s1151_s11, %s1619_s5 }
  0x19   :  { %p1157_p10 = pnand %p1155_p9, %p1152_p8 }
  0x1b   :  { %1160 = shalt.err (!%p1157_p10)
}
  0x1c   :  { %s1161_s18 = scalar_lea.vmem %s1363_s16, 4096  ;;  %p1166_p12 = scmp.lt.s32.totalorder %s1363_s16, %s1363_s16 }
  0x1d   :  { %p1162_p11 = scmp.ne.s32.totalorder %s1363_s16, %s1161_s18  ;;  %p1167_p13 = scmp.lt.s32.totalorder %s1161_s18, %s1161_s18 }
  0x1f   :  { %p1168_p0 = por %p1167_p13, %p1166_p12 }
  0x21   :  { %p1169_p1 = pnand %p1168_p0, %p1162_p11 }
  0x23   :  { %1172 = shalt.err (!%p1169_p1)
}
  0x24   :  { %s1297_s2 = smov 128   ;;  %s1298_s14 = smov 8  }
  0x25   :  { %72 = dma.hbm_to_vmem [thread:$0]  %s1619_s5, 4096, %s1363_s16, [#allocation11], %s1297_s2, %s1297_s2, %s1298_s14  }
  0x26   :  { %s1299_s21 = smov [#allocation4]   ;;  %s1300_s23 = smov [#allocation9]  }
  0x27   :  { %s26_s22 = sshll.u32 %s1299_s21, 4  ;;  %s52_s24 = sshll.u32 %s1300_s23, 4  ;;  %s27_s22 = int_to_ptr.vmem [resolvable:$true] %s26_s22  ;;  %s1400_s24 = int_to_ptr.vmem [resolvable:$true] %s52_s24 }
  0x28   :  { %s1173_s29 = scalar_lea.hbm %s1614_s0, 512 }
  0x29   :  { %p1174_p2 = scmp.ne.s32.totalorder %s1614_s0, %s1173_s29  ;;  %p1177_p3 = scmp.lt.u32.totalorder %s1173_s29, %s1614_s0 }
  0x2b   :  { %p1179_p4 = pnand %p1177_p3, %p1174_p2 }
  0x2d   :  { %1182 = shalt.err (!%p1179_p4)
}
  0x2e   :  { %s1183_s5 = scalar_lea.vmem %s27_s22, 512  ;;  %p1188_p6 = scmp.lt.s32.totalorder %s27_s22, %s27_s22 }
  0x2f   :  { %p1184_p5 = scmp.ne.s32.totalorder %s27_s22, %s1183_s5  ;;  %p1189_p7 = scmp.lt.s32.totalorder %s1183_s5, %s1183_s5 }
  0x31   :  { %p1190_p8 = por %p1189_p7, %p1188_p6 }
  0x33   :  { %p1191_p9 = pnand %p1190_p8, %p1184_p5 }
  0x35   :  { %1194 = shalt.err (!%p1191_p9)
}
  0x36   :  { %32 = dma.hbm_to_vmem [thread:$0]  %s1614_s0, 512, %s27_s22, [#allocation5], %s1295_s25, %s1295_s25, %s1296_s26  }
  0x37   :  { %s1195_s19 = scalar_lea.hbm %s1617_s3, 8192 }
  0x38   :  { %p1196_p10 = scmp.ne.s32.totalorder %s1617_s3, %s1195_s19  ;;  %p1199_p11 = scmp.lt.u32.totalorder %s1195_s19, %s1617_s3 }
  0x3a   :  { %p1201_p12 = pnand %p1199_p11, %p1196_p10 }
  0x3c   :  { %1204 = shalt.err (!%p1201_p12)
}
  0x3d   :  { %s1205_s28 = scalar_lea.vmem %s1400_s24, 8192  ;;  %p1210_p0 = scmp.lt.s32.totalorder %s1400_s24, %s1400_s24 }
  0x3e   :  { %p1206_p13 = scmp.ne.s32.totalorder %s1400_s24, %s1205_s28  ;;  %p1211_p1 = scmp.lt.s32.totalorder %s1205_s28, %s1205_s28 }
  0x40   :  { %p1212_p2 = por %p1211_p1, %p1210_p0 }
  0x42   :  { %p1213_p3 = pnand %p1212_p2, %p1206_p13 }
  0x44   :  { %1216 = shalt.err (!%p1213_p3)
}
  0x45   :  { %58 = dma.hbm_to_vmem [thread:$0]  %s1617_s3, 8192, %s1400_s24, [#allocation8], %s1295_s25, %s1295_s25, %s1296_s26  }
  0x46   :  { %s1301_s29 = smov [#allocation12]   ;;  %s1217_s13 = scalar_lea.hbm %s1621_s7, 2048 }
  0x47   :  { %s80_s30 = sshll.u32 %s1301_s29, 4  ;;  %p1218_p4 = scmp.ne.s32.totalorder %s1621_s7, %s1217_s13  ;;  %s81_s30 = int_to_ptr.vmem [resolvable:$true] %s80_s30 }
  0x48   :  { %p1221_p5 = scmp.lt.u32.totalorder %s1217_s13, %s1621_s7 }
  0x4a   :  { %p1223_p6 = pnand %p1221_p5, %p1218_p4 }
  0x4c   :  { %1226 = shalt.err (!%p1223_p6)
}
  0x4d   :  { %s1227_s18 = scalar_lea.vmem %s81_s30, 2048  ;;  %p1232_p8 = scmp.lt.s32.totalorder %s81_s30, %s81_s30 }
  0x4e   :  { %p1228_p7 = scmp.ne.s32.totalorder %s81_s30, %s1227_s18  ;;  %p1233_p9 = scmp.lt.s32.totalorder %s1227_s18, %s1227_s18 }
  0x50   :  { %p1234_p10 = por %p1233_p9, %p1232_p8 }
  0x52   :  { %p1235_p11 = pnand %p1234_p10, %p1228_p7 }
  0x54   :  { %1238 = shalt.err (!%p1235_p11)
}
  0x55   :  { %86 = dma.hbm_to_vmem [thread:$0]  %s1621_s7, 2048, %s81_s30, [#allocation11], %s1297_s2, %s1297_s2, %s1298_s14  }
  0x56   :  { %1283 = dma.done.wait [#allocation5], 512  }
  0x57   :  { %1284 = vsyncadd [#allocation5], 4294966784 }
  0x58   :  { %1285 = dma.done.wait [#allocation8], 16384  }
  0x59   :  { %1286 = vsyncadd [#allocation8], 4294950912 }
  0x5a   :  { %1287 = dma.done.wait [#allocation11], 6144  }
  0x5b   :  { %1288 = vsyncadd [#allocation11], 4294961152  ;;  %v324_v0 = vld [vmem:[#allocation9 + $0x8] sm:$0xff]  ;;  %v326_v1 = vld [vmem:[#allocation9 + $0x18] sm:$0xff]  ;;  %vm391_vm0 = vcmask 1041409   ;;  %vm1303_vm9 = vmmov 0  }
  0x5c   :  { %v323_v2 = vld [vmem:[#allocation9] sm:$0xff]  ;;  %v915_v3 = vpack.c.bf16 %v326_v1, %v324_v0  ;;  %v325_v4 = vld [vmem:[#allocation9 + $0x10] sm:$0xff]  ;;  %v328_v5 = vld [vmem:[#allocation9 + $0x28] sm:$0xff]  ;;  %vm766_vm10 = vcmask 1041408  }
  0x5d   :  { %v330_v6 = vld [vmem:[#allocation9 + $0x38] sm:$0xff]  ;;  %v917_v7 = vpack.c.bf16 %v325_v4, %v323_v2  ;;  %v327_v9 = vld [vmem:[#allocation9 + $0x20] sm:$0xff]  ;;  %v329_v10 = vld [vmem:[#allocation9 + $0x30] sm:$0xff] }
  0x5e   :  { %v919_v8 = vpack.c.bf16 %v330_v6, %v328_v5  ;;  %v332_v11 = vld [vmem:[#allocation9 + $0x48] sm:$0xff]  ;;  %916 = vmatprep.subr.bf16.mxu0 %v915_v3  ;;  %v334_v12 = vld [vmem:[#allocation9 + $0x58] sm:$0xff]  ;;  %v921_v13 = vpack.c.bf16 %v329_v10, %v327_v9  ;;  %v331_v15 = vld [vmem:[#allocation9 + $0x40] sm:$0xff] }
  0x5f   :  { %918 = vmatpush1.bf16.msra.mxu0 %v917_v7  ;;  %v923_v14 = vpack.c.bf16 %v334_v12, %v332_v11  ;;  %v333_v16 = vld [vmem:[#allocation9 + $0x50] sm:$0xff]  ;;  %v336_v17 = vld [vmem:[#allocation9 + $0x68] sm:$0xff]  ;;  %v338_v18 = vld [vmem:[#allocation9 + $0x78] sm:$0xff] }
  0x60   :  { %920 = vmatprep.subr.bf16.mxu0 %v919_v8  ;;  %v925_v19 = vpack.c.bf16 %v333_v16, %v331_v15  ;;  %v927_v20 = vpack.c.bf16 %v338_v18, %v336_v17  ;;  %v335_v21 = vld [vmem:[#allocation9 + $0x60] sm:$0xff]  ;;  %v337_v22 = vld [vmem:[#allocation9 + $0x70] sm:$0xff]  ;;  %v340_v23 = vld [vmem:[#allocation9 + $0x88] sm:$0xff] }
  0x61   :  { %v342_v24 = vld [vmem:[#allocation9 + $0x98] sm:$0xff]  ;;  %v929_v25 = vpack.c.bf16 %v337_v22, %v335_v21  ;;  %v339_v27 = vld [vmem:[#allocation9 + $0x80] sm:$0xff]  ;;  %v341_v28 = vld [vmem:[#allocation9 + $0x90] sm:$0xff] }
  0x62   :  { %v931_v26 = vpack.c.bf16 %v342_v24, %v340_v23  ;;  %v344_v29 = vld [vmem:[#allocation9 + $0xa8] sm:$0xff]  ;;  %v346_v30 = vld [vmem:[#allocation9 + $0xb8] sm:$0xff]  ;;  %v343_v31 = vld [vmem:[#allocation9 + $0xa0] sm:$0xff]  ;;  %v933_v34 = vpack.c.bf16 %v341_v28, %v339_v27 }
  0x63   :  { %922 = vmatpush1.bf16.msra.mxu0 %v921_v13  ;;  %v345_v32 = vld [vmem:[#allocation9 + $0xb0] sm:$0xff]  ;;  %v348_v33 = vld [vmem:[#allocation9 + $0xc8] sm:$0xff]  ;;  %v350_v35 = vld [vmem:[#allocation9 + $0xd8] sm:$0xff]  ;;  %v935_v38 = vpack.c.bf16 %v346_v30, %v344_v29 }
  0x64   :  { %924 = vmatprep.subr.bf16.mxu0 %v923_v14  ;;  %v347_v36 = vld [vmem:[#allocation9 + $0xc0] sm:$0xff]  ;;  %v349_v37 = vld [vmem:[#allocation9 + $0xd0] sm:$0xff]  ;;  %v352_v39 = vld [vmem:[#allocation9 + $0xe8] sm:$0xff]  ;;  %v937_v47 = vpack.c.bf16 %v345_v32, %v343_v31  ;;  %v939_v48 = vpack.c.bf16 %v350_v35, %v348_v33 }
  0x65   :  { %v354_v40 = vld [vmem:[#allocation9 + $0xf8] sm:$0xff]  ;;  %v1452_v41 = vld [vmem:[#allocation9 + $0xe0] sm:$0xff]  ;;  %v1454_v42 = vld [vmem:[#allocation9 + $0xf0] sm:$0xff]  ;;  %v941_v51 = vpack.c.bf16 %v349_v37, %v347_v36 }
  0x66   :  { %v1456_v43 = vld [vmem:[#allocation9 + $0x108] sm:$0xff]  ;;  %v1458_v44 = vld [vmem:[#allocation9 + $0x118] sm:$0xff]  ;;  %v1460_v45 = vld [vmem:[#allocation9 + $0x100] sm:$0xff]  ;;  %v943_v52 = vpack.c.bf16 %v354_v40, %v352_v39  ;;  %v945_v53 = vpack.c.bf16 %v1454_v42, %v1452_v41 }
  0x67   :  { %926 = vmatpush1.bf16.msra.mxu0 %v925_v19  ;;  %v1462_v46 = vld [vmem:[#allocation9 + $0x110] sm:$0xff]  ;;  %v1464_v49 = vld [vmem:[#allocation9 + $0x128] sm:$0xff]  ;;  %v1466_v50 = vld [vmem:[#allocation9 + $0x138] sm:$0xff]  ;;  %v947_v54 = vpack.c.bf16 %v1458_v44, %v1456_v43 }
  0x68   :  { %928 = vmatprep.subr.bf16.mxu0 %v927_v20  ;;  %v117_v55 = vld [vmem:[#allocation4 + $0x8] sm:$0xff]  ;;  %v119_v56 = vld [vmem:[#allocation4 + $0x18] sm:$0xff]  ;;  %v949_v57 = vpack.c.bf16 %v1462_v46, %v1460_v45  ;;  %v116_v61 = vld [vmem:[#allocation4] sm:$0xff]  ;;  %v951_v62 = vpack.c.bf16 %v1466_v50, %v1464_v49 }
  0x69   :  { %v137_v58 = vmul.f32 %v117_v55, %v117_v55  ;;  %v139_v59 = vmul.f32 %v119_v56, %v119_v56  ;;  %v161_v60 = vrot.slane %v117_v55, 4  ;;  %v173_v63 = vrot.slane %v119_v56, 4  ;;  %v118_v0 = vld [vmem:[#allocation4 + $0x10] sm:$0xff]  ;;  %v359_v31 = vld [vmem:[#allocation9 + $0x120] sm:$0xff]  ;;  %v364_v41 = vld [vmem:[#allocation9 + $0x148] sm:$0xff] }
  0x6a   :  { %v136_v1 = vmul.f32 %v116_v61, %v116_v61  ;;  %v155_v2 = vrot.slane %v116_v61, 4  ;;  %v138_v6 = vmul.f32 %v118_v0, %v118_v0  ;;  %v167_v9 = vrot.slane %v118_v0, 4  ;;  %v361_v32 = vld [vmem:[#allocation9 + $0x130] sm:$0xff]  ;;  %v366_v42 = vld [vmem:[#allocation9 + $0x158] sm:$0xff]  ;;  %v368_v45 = vld [vmem:[#allocation9 + $0x168] sm:$0xff] }
  0x6b   :  { %930 = vmatpush1.bf16.msra.mxu0 %v929_v25  ;;  %v162_v3 = vadd.f32 %v161_v60, %v117_v55  ;;  %v189_v4 = vrot.slane %v137_v58, 4  ;;  %v201_v5 = vrot.slane %v139_v59, 4  ;;  %v174_v7 = vadd.f32 %v173_v63, %v119_v56  ;;  %v363_v63 = vld [vmem:[#allocation9 + $0x140] sm:$0xff]  ;;  %v370_v46 = vld [vmem:[#allocation9 + $0x178] sm:$0xff] }
  0x6c   :  { %932 = vmatprep.subr.bf16.mxu0 %v931_v26  ;;  %v156_v8 = vadd.f32 %v155_v2, %v116_v61  ;;  %v183_v10 = vrot.slane %v136_v1, 4  ;;  %v195_v14 = vrot.slane %v138_v6, 4  ;;  %v168_v17 = vadd.f32 %v167_v9, %v118_v0  ;;  %v365_v0 = vld [vmem:[#allocation9 + $0x150] sm:$0xff]  ;;  %v367_v9 = vld [vmem:[#allocation9 + $0x160] sm:$0xff] }
  0x6d   :  { %v163_v11 = vrot.slane %v162_v3, 2  ;;  %v190_v12 = vadd.f32 %v189_v4, %v137_v58  ;;  %v202_v13 = vadd.f32 %v201_v5, %v139_v59  ;;  %v175_v15 = vrot.slane %v174_v7, 2 }
  0x6e   :  { %v157_v16 = vrot.slane %v156_v8, 2  ;;  %v184_v18 = vadd.f32 %v183_v10, %v136_v1  ;;  %v196_v22 = vadd.f32 %v195_v14, %v138_v6  ;;  %v169_v25 = vrot.slane %v168_v17, 2  ;;  %v369_v10 = vld [vmem:[#allocation9 + $0x170] sm:$0xff]  ;;  %v372_v14 = vld [vmem:[#allocation9 + $0x188] sm:$0xff] }
  0x6f   :  { %934 = vmatpush1.bf16.msra.mxu0 %v933_v34  ;;  %v164_v19 = vadd.f32 %v163_v11, %v162_v3  ;;  %v191_v20 = vrot.slane %v190_v12, 2  ;;  %v203_v21 = vrot.slane %v202_v13, 2  ;;  %v176_v23 = vadd.f32 %v175_v15, %v174_v7  ;;  %v374_v15 = vld [vmem:[#allocation9 + $0x198] sm:$0xff] }
  0x70   :  { %936 = vmatprep.subr.bf16.mxu0 %v935_v38  ;;  %v158_v24 = vadd.f32 %v157_v16, %v156_v8  ;;  %v185_v26 = vrot.slane %v184_v18, 2  ;;  %v197_v30 = vrot.slane %v196_v22, 2  ;;  %v170_v35 = vadd.f32 %v169_v25, %v168_v17 }
  0x71   :  { %v165_v27 = vrot.slane %v164_v19, 1  ;;  %v192_v28 = vadd.f32 %v191_v20, %v190_v12  ;;  %v204_v29 = vadd.f32 %v203_v21, %v202_v13  ;;  %v177_v33 = vrot.slane %v176_v23, 1 }
  0x72   :  { %v159_v34 = vrot.slane %v158_v24, 1  ;;  %v186_v36 = vadd.f32 %v185_v26, %v184_v18  ;;  %v198_v40 = vadd.f32 %v197_v30, %v196_v22  ;;  %v957_v50 = vpack.c.bf16 %v365_v0, %v363_v63  ;;  %v564_v0 = vld [vmem:[#allocation10 + $0x10] sm:$0xff] }
  0x73   :  { %938 = vmatpush1.bf16.msra.mxu0 %v937_v47  ;;  %v166_v37 = vadd.f32 %v165_v27, %v164_v19  ;;  %v193_v38 = vrot.slane %v192_v28, 1  ;;  %v205_v39 = vrot.slane %v204_v29, 1  ;;  %v178_v43 = vadd.f32 %v177_v33, %v176_v23  ;;  %v371_v23 = vld [vmem:[#allocation9 + $0x180] sm:$0xff]  ;;  %v380_v33 = vld [vmem:[#allocation9 + $0x1c8] sm:$0xff] }
  0x74   :  { %940 = vmatprep.subr.bf16.mxu0 %v939_v48  ;;  %v160_v44 = vadd.f32 %v159_v34, %v158_v24  ;;  %v171_v47 = vrot.slane %v170_v35, 1  ;;  %v187_v48 = vrot.slane %v186_v36, 1  ;;  %v199_v58 = vrot.slane %v198_v40, 1  ;;  %v373_v24 = vld [vmem:[#allocation9 + $0x190] sm:$0xff] }
  0x75   :  { %v1478_v55 = vmul.f32 0.125, %v178_v43  ;;  %v206_v60 = vadd.f32 %v205_v39, %v204_v29  ;;  %v959_v8 = vpack.c.bf16 %v370_v46, %v368_v45  ;;  %v961_v20 = vpack.c.bf16 %v369_v10, %v367_v9  ;;  %v378_v29 = vld [vmem:[#allocation9 + $0x1b8] sm:$0xff]  ;;  %v1509_v39 = vld [vmem:[#allocation9 + $0x1e8] sm:$0xff]  ;;  %v582_v46 = vld [vmem:[#allocation10 + $0xa0] sm:$0xff] }
  0x76   :  { %v172_v56 = vadd.f32 %v171_v47, %v170_v35  ;;  %v1480_v59 = vmul.f32 0.125, %v160_v44  ;;  %v188_v2 = vadd.f32 %v187_v48, %v186_v36  ;;  %v200_v6 = vadd.f32 %v199_v58, %v198_v40  ;;  %v382_v36 = vld [vmem:[#allocation9 + $0x1d8] sm:$0xff]  ;;  %v579_v43 = vld [vmem:[#allocation10 + $0x88] sm:$0xff]  ;;  %v562_v44 = vld [vmem:[#allocation10] sm:$0xff] }
  0x77   :  { %942 = vmatpush1.bf16.msra.mxu0 %v941_v51  ;;  %v953_v51 = vpack.c.bf16 %v361_v32, %v359_v31  ;;  %v214_v1 = vmul.f32 8.0, %v1478_v55  ;;  %v963_v22 = vpack.c.bf16 %v374_v15, %v372_v14  ;;  %v965_v30 = vpack.c.bf16 %v373_v24, %v371_v23  ;;  %v375_v31 = vld [vmem:[#allocation9 + $0x1a0] sm:$0xff]  ;;  %v377_v32 = vld [vmem:[#allocation9 + $0x1b0] sm:$0xff]  ;;  %v1511_v40 = vld [vmem:[#allocation9 + $0x1f8] sm:$0xff] }
  0x78   :  { %944 = vmatprep.subr.bf16.mxu0 %v943_v52  ;;  %v1476_v52 = vmul.f32 0.125, %v166_v37  ;;  %v1490_v3 = vmul.f32 0.125, %v172_v56  ;;  %v211_v4 = vmul.f32 8.0, %v1480_v59  ;;  %v379_v37 = vld [vmem:[#allocation9 + $0x1c0] sm:$0xff]  ;;  %v563_v47 = vld [vmem:[#allocation10 + $0x8] sm:$0xff]  ;;  %v580_v48 = vld [vmem:[#allocation10 + $0x90] sm:$0xff]  ;;  %v969_v56 = vpack.c.bf16 %v377_v32, %v375_v31 }
  0x79   :  { %v218_v5 = vmul.f32 %v214_v1, %v1478_v55  ;;  %v1516_v58 = vld [vmem:[#allocation9 + $0x1f0] sm:$0xff]  ;;  %v565_v1 = vld [vmem:[#allocation10 + $0x18] sm:$0xff]  ;;  %v264_v32 = vld [vmem:[#allocation7 + $0x28] sm:$0xff] }
  0x7a   :  { %v212_v61 = vmul.f32 8.0, %v1476_v52  ;;  %v213_v7 = vmul.f32 8.0, %v1490_v3  ;;  %v215_v49 = vmul.f32 %v211_v4, %v1480_v59  ;;  %v1045_v4 = vpack.c.bf16 %v563_v47, %v562_v44  ;;  %v261_v31 = vld [vmem:[#allocation7 + $0x10] sm:$0xff]  ;;  %v263_v47 = vld [vmem:[#allocation7 + $0x20] sm:$0xff] }
  0x7b   :  { %946 = vmatpush1.bf16.msra.mxu0 %v945_v53  ;;  %v955_v53 = vpack.c.bf16 %v366_v42, %v364_v41  ;;  %v222_v11 = vsub.f32 %v206_v60, %v218_v5  ;;  %v1513_v41 = vld [vmem:[#allocation9 + $0x1e0] sm:$0xff]  ;;  %v971_v60 = vpack.c.bf16 %v382_v36, %v380_v33  ;;  %v975_v5 = vpack.c.bf16 %v1511_v40, %v1509_v39  ;;  %v266_v33 = vld [vmem:[#allocation7 + $0x38] sm:$0xff]  ;;  %v587_v40 = vld [vmem:[#allocation10 + $0xc8] sm:$0xff] }
  0x7c   :  { %948 = vmatprep.subr.bf16.mxu0 %v947_v54  ;;  %v194_v54 = vadd.f32 %v193_v38, %v192_v28  ;;  %v217_v12 = vmul.f32 %v213_v7, %v1490_v3  ;;  %v219_v13 = vsub.f32 %v188_v2, %v215_v49  ;;  %v376_v28 = vld [vmem:[#allocation9 + $0x1a8] sm:$0xff]  ;;  %v381_v38 = vld [vmem:[#allocation9 + $0x1d0] sm:$0xff]  ;;  %v578_v42 = vld [vmem:[#allocation10 + $0x80] sm:$0xff]  ;;  %v1049_v49 = vpack.c.bf16 %v565_v1, %v564_v0 }
  0x7d   :  { %v226_v17 = vmul.f32 0.14285715, %v222_v11  ;;  %v967_v35 = vpack.c.bf16 %v378_v29, %v376_v28  ;;  %v1043_v63 = vpack.c.bf16 %v579_v43, %v578_v42  ;;  %v973_v2 = vpack.c.bf16 %v381_v38, %v379_v37  ;;  %v568_v37 = vld [vmem:[#allocation10 + $0x30] sm:$0xff]  ;;  %v586_v39 = vld [vmem:[#allocation10 + $0xc0] sm:$0xff] }
  0x7e   :  { %v221_v18 = vsub.f32 %v200_v6, %v217_v12  ;;  %v223_v19 = vmul.f32 0.14285715, %v219_v13  ;;  %v977_v6 = vpack.c.bf16 %v1516_v58, %v1513_v41  ;;  %v584_v12 = vld [vmem:[#allocation10 + $0xb0] sm:$0xff]  ;;  %v585_v13 = vld [vmem:[#allocation10 + $0xb8] sm:$0xff]  ;;  %v983_v43 = vpack.c.bf16 %v266_v33, %v264_v32  ;;  %v287_v33 = vld [vmem:[#allocation7 + $0xe0] sm:$0xff] }
  0x7f   :  { %950 = vmatpush1.bf16.msra.mxu0 %v949_v57  ;;  %v216_v57 = vmul.f32 %v212_v61, %v1476_v52  ;;  %v1500_v25 = vmax.f32 %v226_v17, 0.0  ;;  %v1525_v61 = vsel %vm391_vm0, %v1490_v3, %v1480_v59  ;;  %1044 = vmatprep.subr.bf16.mxu1 %v1043_v63  ;;  %v1055_v28 = vpack.c.bf16 %v585_v13, %v584_v12  ;;  %v589_v63 = vld [vmem:[#allocation10 + $0xd8] sm:$0xff]  ;;  %v275_v13 = vld [vmem:[#allocation7 + $0x80] sm:$0xff] }
  0x80   :  { %952 = vmatprep.subr.bf16.mxu0 %v951_v62  ;;  %v225_v26 = vmul.f32 0.14285715, %v221_v18  ;;  %v1502_v27 = vmax.f32 %v223_v19, 0.0  ;;  %1046 = vmatpush3.bf16.msra.mxu1 %v1045_v4  ;;  %v1059_v58 = vpack.c.bf16 %v587_v40, %v586_v39  ;;  %v269_v4 = vld [vmem:[#allocation7 + $0x50] sm:$0xff]  ;;  %v291_v39 = vld [vmem:[#allocation7 + $0x100] sm:$0xff] }
  0x81   :  { %v220_v62 = vsub.f32 %v194_v54, %v216_v57  ;;  %v1520_v54 = vld [vmem:[#allocation7 + $0x18] sm:$0xff]  ;;  %v583_v57 = vld [vmem:[#allocation10 + $0xa8] sm:$0xff]  ;;  %vm254_vm3 = vcmp.eq.f32.partialorder %v1500_v25, inf  ;;  %vm256_vm4 = vcmp.eq.f32.partialorder %v1500_v25, 0.0  ;;  %v257_v10 = vand.u32 2147483648, %v1500_v25  ;;  %v293_v40 = vld [vmem:[#allocation7 + $0x110] sm:$0xff] }
  0x82   :  { %v1506_v34 = vmax.f32 %v225_v26, 0.0  ;;  %v1051_v11 = vpack.c.bf16 %v583_v57, %v582_v46  ;;  %vm233_vm5 = vcmp.eq.f32.partialorder %v1502_v27, inf  ;;  %vm235_vm6 = vcmp.eq.f32.partialorder %v1502_v27, 0.0  ;;  %v259_v26 = vld [vmem:[#allocation7] sm:$0xff]  ;;  %v572_v57 = vld [vmem:[#allocation10 + $0x50] sm:$0xff] }
  0x83   :  { %954 = vmatpush1.bf16.msra.mxu0 %v953_v51  ;;  %v224_v16 = vmul.f32 0.14285715, %v220_v62  ;;  %v581_v51 = vld [vmem:[#allocation10 + $0x98] sm:$0xff]  ;;  %v567_v62 = vld [vmem:[#allocation10 + $0x28] sm:$0xff]  ;;  %v981_v42 = vpack.c.bf16 %v261_v31, %v259_v26 }
  0x84   :  { %956 = vmatprep.subr.bf16.mxu0 %v955_v53  ;;  %v1518_v53 = vld [vmem:[#allocation7 + $0x8] sm:$0xff]  ;;  %v1047_v45 = vpack.c.bf16 %v581_v51, %v580_v48  ;;  %vm247_vm7 = vcmp.eq.f32.partialorder %v1506_v34, inf  ;;  %v250_v24 = vand.u32 2147483648, %v1506_v34  ;;  %vm249_vm8 = vcmp.eq.f32.partialorder %v1506_v34, 0.0 }
  0x85   :  { %v1498_v21 = vmax.f32 %v224_v16, 0.0  ;;  %v979_v59 = vpack.c.bf16 %v1520_v54, %v1518_v53  ;;  %v236_v16 = vand.u32 2147483648, %v1502_v27  ;;  %v268_v48 = vld [vmem:[#allocation7 + $0x48] sm:$0xff]  ;;  %v472_v51 = vsel %vm391_vm0, %v1478_v55, %v1476_v52  ;;  %v570_v53 = vld [vmem:[#allocation10 + $0x40] sm:$0xff]  ;;  %v274_v52 = vld [vmem:[#allocation7 + $0x78] sm:$0xff] }
  0x86   :  { %1048 = vmatprep.subr.bf16.mxu1 %v1047_v45  ;;  %v571_v54 = vld [vmem:[#allocation10 + $0x48] sm:$0xff] }
  0x87   :  { %958 = vmatpush1.bf16.msra.mxu0 %v957_v50  ;;  %1117 = vrsqrt.f32 %v1498_v21  ;;  %vm240_vm1 = vcmp.eq.f32.partialorder %v1498_v21, inf  ;;  %vm242_vm2 = vcmp.eq.f32.partialorder %v1498_v21, 0.0  ;;  %v243_v7 = vand.u32 2147483648, %v1498_v21  ;;  %v566_v50 = vld [vmem:[#allocation10 + $0x20] sm:$0xff]  ;;  %1050 = vmatpush3.bf16.msra.mxu1 %v1049_v49  ;;  %v272_v45 = vld [vmem:[#allocation7 + $0x68] sm:$0xff] }
  0x88   :  { %960 = vmatprep.subr.bf16.mxu0 %v959_v8  ;;  %1119 = vrsqrt.f32 %v1500_v25  ;;  %v1053_v19 = vpack.c.bf16 %v567_v62, %v566_v50  ;;  %1052 = vmatprep.subr.bf16.mxu1 %v1051_v11  ;;  %v1061_v46 = vpack.c.bf16 %v571_v54, %v570_v53  ;;  %v271_v49 = vld [vmem:[#allocation7 + $0x60] sm:$0xff]  ;;  %v273_v50 = vld [vmem:[#allocation7 + $0x70] sm:$0xff]  ;;  %v304_v54 = vld [vmem:[#allocation7 + $0x168] sm:$0xff] }
  0x89   :  { %1121 = vrsqrt.f32 %v1502_v27  ;;  %v993_v11 = vpack.c.bf16 %v273_v50, %v271_v49  ;;  %v301_v53 = vld [vmem:[#allocation7 + $0x150] sm:$0xff]  ;;  %v316_v50 = vld [vmem:[#allocation7 + $0x1c8] sm:$0xff] }
  0x8a   :  { %1123 = vrsqrt.f32 %v1506_v34  ;;  %v313_v49 = vld [vmem:[#allocation7 + $0x1b0] sm:$0xff] }
  0x8b   :  { %962 = vmatpush1.bf16.msra.mxu0 %v961_v20  ;;  %1054 = vmatpush3.bf16.msra.mxu1 %v1053_v19  ;;  %v279_v19 = vld [vmem:[#allocation7 + $0xa0] sm:$0xff] }
  0x8c   :  { %964 = vmatprep.subr.bf16.mxu0 %v963_v22  ;;  %1056 = vmatprep.subr.bf16.mxu1 %v1055_v28  ;;  %v283_v28 = vld [vmem:[#allocation7 + $0xc0] sm:$0xff] }
  0x8f   :  { %966 = vmatpush1.bf16.msra.mxu0 %v965_v30 }
  0x90   :  { %968 = vmatprep.subr.bf16.mxu0 %v967_v35 }
  0x91   :  { %v1118_v3 = vpop.eup %1117 }
  0x92   :  { %v1120_v8 = vpop.eup %1119  ;;  %v239_v9 = vmul.f32 %v1118_v3, %v1498_v21 }
  0x93   :  { %970 = vmatpush1.bf16.msra.mxu0 %v969_v56  ;;  %v1122_v14 = vpop.eup %1121  ;;  %v253_v15 = vmul.f32 %v1120_v8, %v1500_v25  ;;  %v276_v8 = vld [vmem:[#allocation7 + $0x88] sm:$0xff] }
  0x94   :  { %972 = vmatprep.subr.bf16.mxu0 %v971_v60  ;;  %v241_v17 = vsel %vm240_vm1, %v1498_v21, %v239_v9  ;;  %v232_v18 = vmul.f32 %v1122_v14, %v1502_v27  ;;  %v1124_v20 = vpop.eup %1123  ;;  %v588_v60 = vld [vmem:[#allocation10 + $0xd0] sm:$0xff]  ;;  %v278_v9 = vld [vmem:[#allocation7 + $0x98] sm:$0xff] }
  0x95   :  { %v244_v22 = vsel %vm242_vm2, %v243_v7, %v241_v17  ;;  %v255_v23 = vsel %vm254_vm3, %v1500_v25, %v253_v15  ;;  %v246_v21 = vmul.f32 %v1124_v20, %v1506_v34  ;;  %v569_v25 = vld [vmem:[#allocation10 + $0x38] sm:$0xff]  ;;  %v1063_v55 = vpack.c.bf16 %v589_v63, %v588_v60  ;;  %v277_v14 = vld [vmem:[#allocation7 + $0x90] sm:$0xff]  ;;  %v280_v15 = vld [vmem:[#allocation7 + $0xa8] sm:$0xff] }
  0x96   :  { %v258_v29 = vsel %vm256_vm4, %v257_v10, %v255_v23  ;;  %v234_v30 = vsel %vm233_vm5, %v1502_v27, %v232_v18  ;;  %v265_v27 = vld [vmem:[#allocation7 + $0x30] sm:$0xff]  ;;  %v1057_v56 = vpack.c.bf16 %v569_v25, %v568_v37  ;;  %v991_v7 = vpack.c.bf16 %v274_v52, %v272_v45  ;;  %v286_v23 = vld [vmem:[#allocation7 + $0xd8] sm:$0xff] }
  0x97   :  { %974 = vmatpush1.bf16.msra.mxu0 %v973_v2  ;;  %v393_v35 = vsel %vm391_vm0, %v258_v29, %v244_v22  ;;  %v237_v36 = vsel %vm235_vm6, %v236_v16, %v234_v30  ;;  %v248_v38 = vsel %vm247_vm7, %v1506_v34, %v246_v21  ;;  %v270_v34 = vld [vmem:[#allocation7 + $0x58] sm:$0xff]  ;;  %v985_v0 = vpack.c.bf16 %v265_v27, %v263_v47  ;;  %v267_v2 = vld [vmem:[#allocation7 + $0x40] sm:$0xff]  ;;  %v281_v20 = vld [vmem:[#allocation7 + $0xb0] sm:$0xff] }
  0x98   :  { %976 = vmatprep.subr.bf16.mxu0 %v975_v5  ;;  %460 = vmatprep.mubr.f32.mxu0 %v393_v35  ;;  %v251_v41 = vsel %vm249_vm8, %v250_v24, %v248_v38  ;;  %v987_v1 = vpack.c.bf16 %v270_v34, %v268_v48  ;;  %v573_v5 = vld [vmem:[#allocation10 + $0x58] sm:$0xff]  ;;  %v989_v3 = vpack.c.bf16 %v269_v4, %v267_v2  ;;  %v284_v22 = vld [vmem:[#allocation7 + $0xc8] sm:$0xff]  ;;  %v285_v29 = vld [vmem:[#allocation7 + $0xd0] sm:$0xff] }
  0x99   :  { %v392_v44 = vsel %vm391_vm0, %v251_v41, %v237_v36  ;;  %1058 = vmatpush3.bf16.msra.mxu1 %v1057_v56  ;;  %v1065_v62 = vpack.c.bf16 %v573_v5, %v572_v57  ;;  %v995_v12 = vpack.c.bf16 %v278_v9, %v276_v8  ;;  %v282_v16 = vld [vmem:[#allocation7 + $0xb8] sm:$0xff]  ;;  %v997_v17 = vpack.c.bf16 %v277_v14, %v275_v13  ;;  %v288_v30 = vld [vmem:[#allocation7 + $0xe8] sm:$0xff]  ;;  %v289_v35 = vld [vmem:[#allocation7 + $0xf0] sm:$0xff] }
  0x9a   :  { %1060 = vmatprep.subr.bf16.mxu1 %v1059_v58  ;;  %v999_v18 = vpack.c.bf16 %v282_v16, %v280_v15  ;;  %v1001_v24 = vpack.c.bf16 %v281_v20, %v279_v19  ;;  %v1003_v26 = vpack.c.bf16 %v286_v23, %v284_v22  ;;  %v290_v21 = vld [vmem:[#allocation7 + $0xf8] sm:$0xff]  ;;  %v1005_v31 = vpack.c.bf16 %v285_v29, %v283_v28  ;;  %v292_v36 = vld [vmem:[#allocation7 + $0x108] sm:$0xff]  ;;  %v295_v47 = vld [vmem:[#allocation7 + $0x120] sm:$0xff] }
  0x9b   :  { %978 = vmatpush1.bf16.msra.mxu0 %v977_v6  ;;  %v590_v6 = vld [vmem:[#allocation10 + $0xe0] sm:$0xff]  ;;  %v1007_v32 = vpack.c.bf16 %v290_v21, %v288_v30  ;;  %v294_v37 = vld [vmem:[#allocation7 + $0x118] sm:$0xff]  ;;  %v1009_v25 = vpack.c.bf16 %v289_v35, %v287_v33  ;;  %v296_v41 = vld [vmem:[#allocation7 + $0x128] sm:$0xff]  ;;  %v1302_v21 = vmov 0.0|0.0  }
  0x9c   :  { %980 = vmatprep.subr.bf16.mxu0 %v979_v59  ;;  %v591_v59 = vld [vmem:[#allocation10 + $0xe8] sm:$0xff]  ;;  %v1011_v38 = vpack.c.bf16 %v294_v37, %v292_v36  ;;  %v297_v27 = vld [vmem:[#allocation7 + $0x130] sm:$0xff]  ;;  %v299_v58 = vld [vmem:[#allocation7 + $0x140] sm:$0xff] }
  0x9d   :  { %1062 = vmatpush3.bf16.msra.mxu1 %v1061_v46  ;;  %v1067_v10 = vpack.c.bf16 %v591_v59, %v590_v6  ;;  %v300_v48 = vld [vmem:[#allocation7 + $0x148] sm:$0xff]  ;;  %v1017_v56 = vpack.c.bf16 %v297_v27, %v295_v47  ;;  %v306_v60 = vld [vmem:[#allocation7 + $0x178] sm:$0xff]  ;;  %v1021_v63 = vpack.c.bf16 %v301_v53, %v299_v58  ;;  %v305_v2 = vld [vmem:[#allocation7 + $0x170] sm:$0xff] }
  0x9e   :  { %461 = vmatmul.mubr.f32.vlgmr.msra.gmra.mrb[0].mxu0 %v392_v44  ;;  %1064 = vmatprep.subr.bf16.mxu1 %v1063_v55  ;;  %v308_v4 = vld [vmem:[#allocation7 + $0x188] sm:$0xff]  ;;  %v310_v45 = vld [vmem:[#allocation7 + $0x198] sm:$0xff]  ;;  %v307_v55 = vld [vmem:[#allocation7 + $0x180] sm:$0xff] }
  0x9f   :  { %982 = vmatpush1.bf16.msra.mxu0 %v981_v42  ;;  %539 = vmatprep.mubr.f32.mxu0 %v472_v51  ;;  %v298_v42 = vld [vmem:[#allocation7 + $0x138] sm:$0xff]  ;;  %v1027_v52 = vpack.c.bf16 %v310_v45, %v308_v4  ;;  %v309_v57 = vld [vmem:[#allocation7 + $0x190] sm:$0xff]  ;;  %v312_v5 = vld [vmem:[#allocation7 + $0x1a8] sm:$0xff] }
  0xa0   :  { %984 = vmatprep.subr.bf16.mxu0 %v983_v43  ;;  %v1013_v43 = vpack.c.bf16 %v293_v40, %v291_v39  ;;  %v1015_v44 = vpack.c.bf16 %v298_v42, %v296_v41  ;;  %v302_v51 = vld [vmem:[#allocation7 + $0x158] sm:$0xff]  ;;  %v1029_v59 = vpack.c.bf16 %v309_v57, %v307_v55  ;;  %v319_v16 = vld [vmem:[#allocation7 + $0x1e0] sm:$0xff]  ;;  %v575_v20 = vld [vmem:[#allocation10 + $0x68] sm:$0xff] }
  0xa1   :  { %1066 = vmatpush3.bf16.msra.mxu1 %v1065_v62  ;;  %v1019_v34 = vpack.c.bf16 %v302_v51, %v300_v48  ;;  %v314_v6 = vld [vmem:[#allocation7 + $0x1b8] sm:$0xff]  ;;  %v574_v19 = vld [vmem:[#allocation10 + $0x60] sm:$0xff]  ;;  %v592_v23 = vld [vmem:[#allocation10 + $0xf0] sm:$0xff] }
  0xa2   :  { %1068 = vmatprep.subr.bf16.mxu1 %v1067_v10  ;;  %v318_v62 = vld [vmem:[#allocation7 + $0x1d8] sm:$0xff]  ;;  %v315_v10 = vld [vmem:[#allocation7 + $0x1c0] sm:$0xff]  ;;  %v1069_v22 = vpack.c.bf16 %v575_v20, %v574_v19  ;;  %v576_v28 = vld [vmem:[#allocation10 + $0x70] sm:$0xff] }
  0xa3   :  { %986 = vmatpush1.bf16.msra.mxu0 %v985_v0  ;;  %v1023_v0 = vpack.c.bf16 %v306_v60, %v304_v54  ;;  %v1035_v9 = vpack.c.bf16 %v318_v62, %v316_v50  ;;  %v322_v13 = vld [vmem:[#allocation7 + $0x1f8] sm:$0xff]  ;;  %v672_v40 = vld [vmem:[#allocation12] sm:$0xff]  ;;  %v673_v41 = vld [vmem:[#allocation12 + $0x8] sm:$0xff] }
  0xa4   :  { %988 = vmatprep.subr.bf16.mxu0 %v987_v1  ;;  %v303_v1 = vld [vmem:[#allocation7 + $0x160] sm:$0xff]  ;;  %v577_v29 = vld [vmem:[#allocation10 + $0x78] sm:$0xff]  ;;  %v674_v27 = vld [vmem:[#allocation12 + $0x10] sm:$0xff] }
  0xa5   :  { %v1025_v46 = vpack.c.bf16 %v305_v2, %v303_v1  ;;  %1070 = vmatpush3.bf16.msra.mxu1 %v1069_v22  ;;  %v1073_v30 = vpack.c.bf16 %v577_v29, %v576_v28  ;;  %v675_v48 = vld [vmem:[#allocation12 + $0x18] sm:$0xff]  ;;  %v678_v53 = vld [vmem:[#allocation12 + $0x30] sm:$0xff] }
  0xa6   :  { %v1079_v51 = vpack.c.bf16 %v675_v48, %v674_v27  ;;  %v679_v54 = vld [vmem:[#allocation12 + $0x38] sm:$0xff]  ;;  %v682_v2 = vld [vmem:[#allocation12 + $0x50] sm:$0xff] }
  0xa7   :  { %990 = vmatpush1.bf16.msra.mxu0 %v989_v3  ;;  %v1031_v3 = vpack.c.bf16 %v314_v6, %v312_v5  ;;  %v1085_v60 = vpack.c.bf16 %v679_v54, %v678_v53  ;;  %v683_v4 = vld [vmem:[#allocation12 + $0x58] sm:$0xff]  ;;  %v686_v57 = vld [vmem:[#allocation12 + $0x70] sm:$0xff] }
  0xa8   :  { %992 = vmatprep.subr.bf16.mxu0 %v991_v7  ;;  %v311_v7 = vld [vmem:[#allocation7 + $0x1a0] sm:$0xff]  ;;  %v1091_v45 = vpack.c.bf16 %v683_v4, %v682_v2  ;;  %v687_v5 = vld [vmem:[#allocation12 + $0x78] sm:$0xff] }
  0xa9   :  { %v1033_v8 = vpack.c.bf16 %v313_v49, %v311_v7  ;;  %v1097_v6 = vpack.c.bf16 %v687_v5, %v686_v57  ;;  %v825_v7 = vld [vmem:[%s1620_s6] ss:$0 sm:$0xff] }
  0xab   :  { %994 = vmatpush1.bf16.msra.mxu0 %v993_v11  ;;  %v317_v11 = vld [vmem:[#allocation7 + $0x1d0] sm:$0xff] }
  0xac   :  { %996 = vmatprep.subr.bf16.mxu0 %v995_v12  ;;  %v320_v12 = vld [vmem:[#allocation7 + $0x1e8] sm:$0xff]  ;;  %v1037_v14 = vpack.c.bf16 %v317_v11, %v315_v10  ;;  %v826_v10 = vld [vmem:[%s1622_s8] ss:$0 sm:$0xff]  ;;  %s1306_s8 = smov [#allocation13]  }
  0xad   :  { %v1039_v15 = vpack.c.bf16 %v322_v13, %v320_v12 }
  0xaf   :  { %998 = vmatpush1.bf16.msra.mxu0 %v997_v17  ;;  %v321_v17 = vld [vmem:[#allocation7 + $0x1f0] sm:$0xff] }
  0xb0   :  { %1000 = vmatprep.subr.bf16.mxu0 %v999_v18  ;;  %v1041_v18 = vpack.c.bf16 %v321_v17, %v319_v16 }
  0xb3   :  { %1002 = vmatpush1.bf16.msra.mxu0 %v1001_v24  ;;  %v593_v24 = vld [vmem:[#allocation10 + $0xf8] sm:$0xff] }
  0xb4   :  { %1004 = vmatprep.subr.bf16.mxu0 %v1003_v26  ;;  %v1071_v26 = vpack.c.bf16 %v593_v24, %v592_v23 }
  0xb6   :  { %1072 = vmatprep.subr.bf16.mxu1 %v1071_v26 }
  0xb7   :  { %1006 = vmatpush1.bf16.msra.mxu0 %v1005_v31  ;;  %1074 = vmatpush3.bf16.msra.mxu1 %v1073_v30  ;;  %v548_v31 = vlaneseq }
  0xb8   :  { %1008 = vmatprep.subr.bf16.mxu0 %v1007_v32  ;;  %1075 = vmatprep.subr.bf16.mxu1 %v1302_v21 }
  0xb9   :  { %v549_v32 = vshrl.u32 %v548_v31, 7  ;;  %v781_v19 = vand.u32 127, %v548_v31 }
  0xbb   :  { %1010 = vmatpush1.bf16.msra.mxu0 %v1009_v25  ;;  %v550_v33 = vsub.s32 0, %v549_v32  ;;  %v554_v35 = vsub.s32 1, %v549_v32 }
  0xbc   :  { %1012 = vmatprep.subr.bf16.mxu0 %v1011_v38 }
  0xbf   :  { %1014 = vmatpush1.bf16.msra.mxu0 %v1013_v43 }
  0xc0   :  { %1016 = vmatprep.subr.bf16.mxu0 %v1015_v44  ;;  %v1076_v44 = vpack.c.bf16 %v673_v41, %v672_v40 }
  0xc3   :  { %1018 = vmatpush1.bf16.msra.mxu0 %v1017_v56  ;;  %v676_v56 = vld [vmem:[#allocation12 + $0x20] sm:$0xff] }
  0xc4   :  { %1020 = vmatprep.subr.bf16.mxu0 %v1019_v34  ;;  %v677_v34 = vld [vmem:[#allocation12 + $0x28] sm:$0xff] }
  0xc5   :  { %v1082_v58 = vpack.c.bf16 %v677_v34, %v676_v56 }
  0xc7   :  { %1022 = vmatpush1.bf16.msra.mxu0 %v1021_v63  ;;  %v680_v63 = vld [vmem:[#allocation12 + $0x40] sm:$0xff] }
  0xc8   :  { %1024 = vmatprep.subr.bf16.mxu0 %v1023_v0  ;;  %v681_v0 = vld [vmem:[#allocation12 + $0x48] sm:$0xff] }
  0xc9   :  { %v1088_v1 = vpack.c.bf16 %v681_v0, %v680_v63 }
  0xcb   :  { %1026 = vmatpush1.bf16.msra.mxu0 %v1025_v46  ;;  %v684_v46 = vld [vmem:[#allocation12 + $0x60] sm:$0xff] }
  0xcc   :  { %1028 = vmatprep.subr.bf16.mxu0 %v1027_v52  ;;  %v685_v52 = vld [vmem:[#allocation12 + $0x68] sm:$0xff] }
  0xcd   :  { %v1094_v55 = vpack.c.bf16 %v685_v52, %v684_v46 }
  0xcf   :  { %1030 = vmatpush1.bf16.msra.mxu0 %v1029_v59  ;;  %v1304_v59 = vmov 0.0  }
  0xd0   :  { %1032 = vmatprep.subr.bf16.mxu0 %v1031_v3 }
  0xd3   :  { %1034 = vmatpush1.bf16.msra.mxu0 %v1033_v8 }
  0xd4   :  { %1036 = vmatprep.subr.bf16.mxu0 %v1035_v9  ;;  %v1305_v9 = vmov 0  }
  0xd5   :  { %1116 = vset.pattern.permute.xlu0 %v1305_v9 }
  0xd7   :  { %1038 = vmatpush1.bf16.msra.mxu0 %v1037_v14 }
  0xd8   :  { %1040 = vmatprep.subr.bf16.mxu0 %v1039_v15  ;;  %v779_v15 = vld [vmem:[%s1615_s1] sm:$0x3]  ;;  %s800_s1 = sshll.u32 %s1306_s8, 4  ;;  %s801_s1 = int_to_ptr.vmem [resolvable:$true] %s800_s1 }
  0xd9   :  { %s1239_s20 = scalar_lea.vmem %s801_s1, 32  ;;  %p1244_p13 = scmp.lt.s32.totalorder %s801_s1, %s801_s1 }
  0xda   :  { %p1240_p12 = scmp.ne.s32.totalorder %s801_s1, %s1239_s20  ;;  %p1245_p0 = scmp.lt.s32.totalorder %s1239_s20, %s1239_s20 }
  0xdb   :  { %1042 = vmatpush1.bf16.msra.mxu0 %v1041_v18 }
  0xdc   :  { %p1246_p1 = por %p1245_p0, %p1244_p13 }
  0xde   :  { %540 = vmatmul.mubr.f32.vlgmr.msra.gmra.mrb[0].mxu0 %v1525_v61  ;;  %v546_v61 = vld [vmem:[%s1618_s4] sm:$0x3]  ;;  %p1247_p2 = pnand %p1246_p1, %p1240_p12 }
  0xdf   :  { %v551_v36 = vrot.slane %v546_v61, %v550_v33  ;;  %v555_v37 = vrot.slane %v546_v61, %v554_v35 }
 0x1b1   :  { %v541_v25 = vpop.f32.mrb[0].mxu0 }
 0x1b2   :  { %v558_v38 = vadd.f32 %v551_v36, %v541_v25  ;;  %v543_v39 = vpop.f32.mrb[1].mxu0 }
 0x1b3   :  { %v559_v42 = vadd.f32 %v555_v37, %v543_v39 }
 0x1b4   :  { %v560_v47 = vmax.f32 %v558_v38, 0.0 }
 0x1b5   :  { %v561_v43 = vmax.f32 %v559_v42, 0.0 }
 0x1b7   :  { %665 = vmatprep.mubr.f32.mxu1 %v561_v43 }
 0x1b8   :  { %666 = vmatmul.mubr.f32.vlgmr.msra.gmra.mrb[0].mxu1 %v560_v47 }
 0x1b9   :  { %1077 = vmatpush3.bf16.msra.mxu1 %v1076_v44  ;;  %912 = vmatprep.mubr.msk.f32.mxu1 %vm1303_vm9, %v1304_v59 }
 0x1ba   :  { %1078 = vmatprep.subr.bf16.mxu1 %v1302_v21 }
 0x1bd   :  { %1080 = vmatpush3.bf16.msra.mxu1 %v1079_v51 }
 0x1be   :  { %1081 = vmatprep.subr.bf16.mxu1 %v1302_v21 }
 0x1c1   :  { %1083 = vmatpush3.bf16.msra.mxu1 %v1082_v58 }
 0x1c2   :  { %1084 = vmatprep.subr.bf16.mxu1 %v1302_v21 }
 0x1c5   :  { %1086 = vmatpush3.bf16.msra.mxu1 %v1085_v60 }
 0x1c6   :  { %1087 = vmatprep.subr.bf16.mxu1 %v1302_v21 }
 0x1c9   :  { %1089 = vmatpush3.bf16.msra.mxu1 %v1088_v1 }
 0x1ca   :  { %1090 = vmatprep.subr.bf16.mxu1 %v1302_v21 }
 0x1cd   :  { %1092 = vmatpush3.bf16.msra.mxu1 %v1091_v45 }
 0x1ce   :  { %1093 = vmatprep.subr.bf16.mxu1 %v1302_v21 }
 0x1d1   :  { %1095 = vmatpush3.bf16.msra.mxu1 %v1094_v55 }
 0x1d2   :  { %1096 = vmatprep.subr.bf16.mxu1 %v1302_v21 }
 0x1d5   :  { %1098 = vmatpush3.bf16.msra.mxu1 %v1097_v6 }
 0x28b   :  { %v860_v3 = vpop.f32.mrb[0].mxu1 }
 0x28c   :  { %v861_v49 = vpop.f32.mrb[1].mxu1 }
 0x28d   :  { %v862_v50 = vadd.f32 %v861_v49, %v860_v3 }
 0x28f   :  { %v668_v62 = vadd.f32 %v862_v50, %v825_v7 }
 0x291   :  { %v671_v8 = vmax.f32 %v668_v62, 0.0 }
 0x293   :  { %913 = vmatmul.mubr.f32.vlgmr.msra.gmra.mrb[2].mxu1 %v671_v8 }
 0x366   :  { %v761_v11 = vpop.f32.mrb[2].mxu1 }
 0x367   :  { %v762_v12 = vadd.f32 %v826_v10, %v761_v11  ;;  %v914_v13 = vpop.f32.mrb[3].mxu1 }
 0x369   :  { %765 = vst [vmem:[#allocation13] sm:$0x3] %v762_v12  ;;  %v767_v14 = vsel %vm766_vm10, %v762_v12, -inf }
 0x36a   :  { %768 = vmax.xlane.f32.xlu0 %v767_v14 }
 0x380   :  { %783 = vperm.xlu0 %1116, %v779_v15  }
 0x3f7   :  { %v769_v16 = vpop.xlane.xlu0 %768 }
 0x3f8   :  { %v770_v17 = vsub.f32 %v762_v12, %v769_v16 }
 0x3fa   :  { %v771_v18 = vmul.f32 1.442695, %v770_v17 }
 0x3fc   :  { %1125 = vpow2.f32 %v771_v18 }
 0x3ff   :  { %v784_v20 = vpop.permute.xlu0 %783 }
 0x400   :  { %vm785_vm11 = vcmp.eq.s32.totalorder %v781_v19, %v784_v20 }
 0x401   :  { %v827_v22 = vsel %vm785_vm11, 1.0, %v1304_v59 }
 0x402   :  { %v788_v26 = vmul.f32 %v827_v22, %v762_v12 }
 0x404   :  { %v789_v28 = vsel %vm766_vm10, %v788_v26, 0.0 }
 0x406   :  { %v1126_v23 = vpop.eup %1125 }
 0x407   :  { %v773_v24 = vsel %vm766_vm10, %v1126_v23, 0.0 }
 0x408   :  { %774 = vadd.xlane.f32.xlu1 %v773_v24 }
 0x40c   :  { %790 = vadd.xlane.f32.xlu1 %v789_v28 }
 0x40d   :  { %1250 = shalt.err (!%p1247_p2)
}
 0x40e   :  { %s1251_s27 = scalar_lea.hbm %s1623_s9, 32 }
 0x40f   :  { %p1252_p3 = scmp.ne.s32.totalorder %s1623_s9, %s1251_s27  ;;  %p1255_p4 = scmp.lt.u32.totalorder %s1251_s27, %s1623_s9 }
 0x411   :  { %p1257_p5 = pnand %p1255_p4, %p1252_p3 }
 0x413   :  { %1260 = shalt.err (!%p1257_p5)
}
 0x414   :  { %803 = dma.vmem_to_hbm [thread:$0]  %s801_s1, 32, %s1623_s9, [#allocation6]  }
 0x415   :  { %s1307_s12 = smov [#allocation14]  }
 0x416   :  { %s810_s13 = sshll.u32 %s1307_s12, 4  ;;  %s811_s13 = int_to_ptr.vmem [resolvable:$true] %s810_s13 }
 0x417   :  { %s1261_s5 = scalar_lea.vmem %s811_s13, 32  ;;  %p1266_p7 = scmp.lt.s32.totalorder %s811_s13, %s811_s13 }
 0x418   :  { %p1262_p6 = scmp.ne.s32.totalorder %s811_s13, %s1261_s5  ;;  %p1267_p8 = scmp.lt.s32.totalorder %s1261_s5, %s1261_s5 }
 0x41a   :  { %p1268_p9 = por %p1267_p8, %p1266_p7 }
 0x41c   :  { %p1269_p10 = pnand %p1268_p9, %p1262_p6 }
 0x495   :  { %v775_v29 = vpop.xlane.xlu1 %774 }
 0x496   :  { %1127 = vlog2.f32 %v775_v29 }
 0x499   :  { %v791_v32 = vpop.xlane.xlu1 %790 }
 0x4a0   :  { %v1128_v30 = vpop.eup %1127 }
 0x4a1   :  { %v777_v21 = vmul.f32 0.6931472, %v1128_v30 }
 0x4a3   :  { %v778_v31 = vadd.f32 %v777_v21, %v769_v16 }
 0x4a5   :  { %v792_v33 = vsub.f32 %v778_v31, %v791_v32 }
 0x4a7   :  { %793 = vst [vmem:[#allocation14] sm:$0x3] %v792_v33 }
 0x4a8   :  { %1272 = shalt.err (!%p1269_p10)
}
 0x4a9   :  { %s1273_s15 = scalar_lea.hbm %s1624_s10, 32 }
 0x4aa   :  { %p1274_p11 = scmp.ne.s32.totalorder %s1624_s10, %s1273_s15  ;;  %p1277_p12 = scmp.lt.u32.totalorder %s1273_s15, %s1624_s10 }
 0x4ac   :  { %p1279_p13 = pnand %p1277_p12, %p1274_p11 }
 0x4ae   :  { %1282 = shalt.err (!%p1279_p13)
}
 0x4af   :  { %813 = dma.vmem_to_hbm [thread:$0]  %s811_s13, 32, %s1624_s10, [#allocation15]  }
 0x4b0   :  { %1289 = dma.done.wait [#allocation6], 32  }
 0x4b1   :  { %1290 = vsyncadd [#allocation6], 4294967264 }
 0x4b2   :  { %1291 = dma.done.wait [#allocation15], 32  }
 0x4b3   :  { %1292 = vsyncadd [#allocation15], 4294967264 }
 0x4b4   :  { %820 = vsyncpa [#allocation5], 1 }
 0x4b5   :  { %821 = vsyncpa [#allocation8], 1 }
 0x4b6   :  { %822 = vsyncpa [#allocation11], 1 }
 0x4b7   :  { %823 = vsyncpa [#allocation6], 1 }
 0x4b8   :  { %824 = vsyncpa [#allocation15], 1 }

</bundles_post_ra>
